<compile_context>
chip_gen: v6e
topology: v6e:2x2x1
jax: 0.10.0
libtpu: 0.0.40
codegen_flags: <defaults>
</compile_context>

<pallas_src>
import math
from functools import partial

import jax
import jax.numpy as jnp
import numpy as np
from jax import lax
from jax.experimental import pallas as pl
from jax.experimental.pallas import tpu as pltpu


def _round_up(x, m):
    return ((x + m - 1) // m) * m


# -----------------------------------------------------------------------------
# Parameter setup: gaussian orthogonal random matrix (deterministic, in-script)
# -----------------------------------------------------------------------------
def _orthogonal_matrix_chunk(cols, key):
    block = jax.random.normal(key, (cols, cols), dtype=jnp.float32)
    q, _ = jnp.linalg.qr(block)
    return q.T


def gaussian_orthogonal_random_matrix(nb_rows, nb_columns, key, scaling=0):
    nb_full_blocks = nb_rows // nb_columns
    keys = jax.random.split(key, nb_full_blocks + 2)
    blocks = []
    for i in range(nb_full_blocks):
        blocks.append(_orthogonal_matrix_chunk(nb_columns, keys[i]))
    remaining_rows = nb_rows - nb_full_blocks * nb_columns
    if remaining_rows > 0:
        q = _orthogonal_matrix_chunk(nb_columns, keys[nb_full_blocks])
        blocks.append(q[:remaining_rows])
    final_matrix = jnp.concatenate(blocks, axis=0)
    if scaling == 0:
        multiplier = jnp.linalg.norm(
            jax.random.normal(keys[-1], (nb_rows, nb_columns), dtype=jnp.float32),
            axis=1)
    elif scaling == 1:
        multiplier = math.sqrt(float(nb_columns)) * jnp.ones((nb_rows,), jnp.float32)
    else:
        raise ValueError(f"Invalid scaling {scaling}")
    return jnp.diag(multiplier) @ final_matrix


# -----------------------------------------------------------------------------
# Pre-pass kernel: global max of k_dash = k @ (data_normalizer * P^T).
# Each (head, tile) step keeps its k_dash tile in VMEM and updates a per-head
# (8, 128) running-max block -> only tiny outputs ever touch HBM.
# -----------------------------------------------------------------------------
def _kmax_kernel(k_ref, pt_ref, mx_ref, *, nb_features, seq_len, tn,
                 needs_row_mask, needs_col_mask):
    s = pl.program_id(1)
    k_dash = jnp.dot(k_ref[0], pt_ref[...],
                     preferred_element_type=jnp.float32)          # (tn, Mp) f32

    mask = None
    if needs_col_mask:
        mask = lax.broadcasted_iota(jnp.int32, k_dash.shape, 1) < nb_features
    if needs_row_mask:
        row_ok = (lax.broadcasted_iota(jnp.int32, k_dash.shape, 0)
                  + s * tn) < seq_len
        mask = row_ok if mask is None else jnp.logical_and(mask, row_ok)
    if mask is not None:
        k_dash = jnp.where(mask, k_dash, -jnp.inf)

    @pl.when(s == 0)
    def _():
        mx_ref[...] = jnp.full(mx_ref.shape, -jnp.inf, mx_ref.dtype)

    mx_ref[...] = jnp.maximum(mx_ref[...], jnp.max(k_dash))


# -----------------------------------------------------------------------------
# Main kernel: per head, stream k/v tiles into (1,Mp)/(Mp,Dv) VMEM accumulators,
# then stream q tiles and write output tiles.  Fused single-step path if nt==1.
# -----------------------------------------------------------------------------
def _fast_attention_kernel(kmax_ref,                       # SMEM (1,) f32
                           q_ref, k_ref, v_ref, pt_ref,    # inputs
                           o_ref,                          # output
                           ksum_ref, ctx_ref,              # VMEM scratch accumulators
                           *, ratio, eps, nb_features, diag_scale,
                           seq_len, tn, nt, fused,
                           needs_row_mask, needs_col_mask):
    s = pl.program_id(1)
    proj_t = pt_ref[...]                 # (D, Mp), data_normalizer already folded in
    m_pad = proj_t.shape[1]
    mm_dtype = q_ref.dtype               # MXU dtype (bf16 inputs stay bf16)
    kmax = kmax_ref[0]

    col_mask = None
    if needs_col_mask:
        col_mask = lax.broadcasted_iota(jnp.int32, (1, m_pad), 1) < nb_features

    def zero_acc():
        ksum_ref[...] = jnp.zeros_like(ksum_ref)
        ctx_ref[...] = jnp.zeros_like(ctx_ref)

    # ---- k phase: accumulate k_sum and context over k/v tiles -----------------
    def k_phase(k_tile_idx):
        k_raw = k_ref[0]                                           # (tn, D)
        k_dash = jnp.dot(k_raw, proj_t,
                         preferred_element_type=jnp.float32)       # (tn, Mp) f32
        k_f32 = k_raw.astype(jnp.float32)
        diag_k = jnp.sum(k_f32 * k_f32, axis=-1, keepdims=True) * diag_scale
        # softmax_kernel(k, is_query=False): GLOBAL max (pre-pass scalar in SMEM)
        k_feat = ratio * (jnp.exp(k_dash - diag_k - kmax) + eps)   # f32
        mask = col_mask
        if needs_row_mask:
            row_ok = (lax.broadcasted_iota(jnp.int32, (k_feat.shape[0], 1), 0)
                      + k_tile_idx * tn) < seq_len
            mask = row_ok if mask is None else jnp.logical_and(row_ok, mask)
        if mask is not None:
            k_feat = jnp.where(mask, k_feat, 0.0)                  # zero padding
        ksum_ref[...] += jnp.sum(k_feat, axis=0, keepdims=True)    # (1, Mp)
        # k_feat^T @ v without a transpose: contract dim 0 of both operands.
        ctx_ref[...] += lax.dot_general(
            k_feat.astype(mm_dtype), v_ref[0],
            dimension_numbers=(((0,), (0,)), ((), ())),
            preferred_element_type=jnp.float32)                    # (Mp, Dv) f32

    # ---- q phase: stream q tiles and write output tiles -----------------------
    def q_phase():
        q_raw = q_ref[0]                                           # (tn, D)
        q_dash = jnp.dot(q_raw, proj_t,
                         preferred_element_type=jnp.float32)       # (tn, Mp) f32
        q_f32 = q_raw.astype(jnp.float32)
        diag_q = jnp.sum(q_f32 * q_f32, axis=-1, keepdims=True) * diag_scale
        # softmax_kernel(q, is_query=True): per-row max over the REAL features.
        if col_mask is not None:
            row_max = jnp.max(jnp.where(col_mask, q_dash, -jnp.inf),
                              axis=-1, keepdims=True)
        else:
            row_max = jnp.max(q_dash, axis=-1, keepdims=True)
        q_feat = ratio * (jnp.exp(q_dash - diag_q - row_max) + eps)
        if col_mask is not None:
            q_feat = jnp.where(col_mask, q_feat, 0.0)
        d = jnp.sum(q_feat * ksum_ref[...], axis=-1, keepdims=True)  # f32
        d_inv = pl.reciprocal(d, approx=True)
        out = jnp.dot(q_feat.astype(mm_dtype), ctx_ref[...].astype(mm_dtype),
                      preferred_element_type=jnp.float32) * d_inv
        o_ref[0] = out.astype(o_ref.dtype)

    if fused:                       # nt == 1: one grid step per head does both
        zero_acc()
        k_phase(0)
        q_phase()
    else:
        @pl.when(s == 0)
        def _():
            zero_acc()

        @pl.when(s < nt)
        def _():
            k_phase(s)

        @pl.when(s >= nt)
        def _():
            q_phase()


def fast_attention(q, k, v, projection_matrix, eps=1e-4, block_n=1024):
    B, H, N, D = q.shape
    Dv = v.shape[-1]
    M = projection_matrix.shape[0]
    BH = B * H

    qf = q.reshape(BH, N, D)
    kf = k.reshape(BH, N, D)
    vf = v.reshape(BH, N, Dv)

    data_normalizer = float(D) ** -0.25
    ratio = float(M) ** -0.5
    diag_scale = 0.5 * data_normalizer * data_normalizer

    # Sequence tile: big tiles amortize per-step overhead; partial tail tiles are
    # masked in the kernel (k phase) / dropped on store (q phase).
    tn = min(block_n, _round_up(N, 8))
    nt = (N + tn - 1) // tn
    fused = nt == 1
    nsteps = 1 if fused else 2 * nt

    # Projection: pre-transpose to (D, Mp), fold in data_normalizer, pad feature
    # dim to a lane multiple (128).  Kept in compute dtype (bf16 inputs -> bf16 MXU).
    m_pad = _round_up(M, 128)
    proj_t = jnp.zeros((D, m_pad), jnp.float32).at[:, :M].set(
        data_normalizer * projection_matrix.astype(jnp.float32).T)
    proj_t = proj_t.astype(q.dtype)

    needs_row_mask = (N % tn) != 0
    needs_col_mask = m_pad != M

    # VMEM request: actual need (double-buffered tiles + projection + scratch +
    # f32 temporaries) with 2x headroom, capped well below v7x's 64 MiB / core.
    itemsize = np.dtype(q.dtype).itemsize
    vmem_est = (2 * 2 * tn * D * itemsize        # q + k tiles, double buffered
                + 2 * 2 * tn * Dv * itemsize     # v + o tiles, double buffered
                + 2 * D * m_pad * itemsize       # projection
                + (m_pad + m_pad * Dv) * 4       # f32 scratch accumulators
                + 8 * tn * m_pad * 4)            # f32 temporaries headroom
    vmem_limit = int(min(32 * 1024 * 1024, max(8 * 1024 * 1024, 2 * vmem_est)))

    # ---- Pre-pass: global max of k_dash (never materialized in HBM) -----------
    kmax_blocks = pl.pallas_call(
        partial(_kmax_kernel, nb_features=M, seq_len=N, tn=tn,
                needs_row_mask=needs_row_mask, needs_col_mask=needs_col_mask),
        out_shape=jax.ShapeDtypeStruct((BH, 8, 128), jnp.float32),
        grid_spec=pltpu.PrefetchScalarGridSpec(
            num_scalar_prefetch=0,
            grid=(BH, nt),
            in_specs=[pl.BlockSpec((1, tn, D), lambda h, s: (h, s, 0)),
                      pl.BlockSpec((D, m_pad), lambda h, s: (0, 0))],
            out_specs=pl.BlockSpec((1, 8, 128), lambda h, s: (h, 0, 0)),
        ),
        compiler_params=pltpu.CompilerParams(
            dimension_semantics=("parallel", "arbitrary"),
            vmem_limit_bytes=vmem_limit),
    )(kf, proj_t)
    kmax = jnp.max(kmax_blocks).reshape(1)      # (1,) f32 scalar, passed via SMEM

    # ---- Main pass -------------------------------------------------------------
    if fused:
        q_idx = lambda h, s: (h, 0, 0)
        kv_idx = lambda h, s: (h, 0, 0)
        o_idx = lambda h, s: (h, 0, 0)
    else:
        q_idx = lambda h, s: (h, jnp.maximum(s - nt, 0), 0)   # q advances in q phase
        kv_idx = lambda h, s: (h, jnp.minimum(s, nt - 1), 0)  # k/v advance in k phase
        o_idx = lambda h, s: (h, jnp.maximum(s - nt, 0), 0)

    kernel = partial(_fast_attention_kernel,
                     ratio=ratio, eps=eps, nb_features=M, diag_scale=diag_scale,
                     seq_len=N, tn=tn, nt=nt, fused=fused,
                     needs_row_mask=needs_row_mask, needs_col_mask=needs_col_mask)

    out = pl.pallas_call(
        kernel,
        out_shape=jax.ShapeDtypeStruct((BH, N, Dv), q.dtype),
        grid_spec=pltpu.PrefetchScalarGridSpec(
            num_scalar_prefetch=0,
            grid=(BH, nsteps),    # heads (parallel / megacore) x [k tiles | q tiles]
            in_specs=[
                pl.BlockSpec(memory_space=pltpu.MemorySpace.SMEM),   # kmax scalar
                pl.BlockSpec((1, tn, D), q_idx),
                pl.BlockSpec((1, tn, D), kv_idx),
                pl.BlockSpec((1, tn, Dv), kv_idx),
                pl.BlockSpec((D, m_pad), lambda h, s: (0, 0)),       # projection
            ],
            out_specs=pl.BlockSpec((1, tn, Dv), o_idx),
            scratch_shapes=[pltpu.VMEM((1, m_pad), jnp.float32),     # k_sum
                            pltpu.VMEM((m_pad, Dv), jnp.float32)],   # context
        ),
        compiler_params=pltpu.CompilerParams(
            dimension_semantics=("parallel", "arbitrary"),
            vmem_limit_bytes=vmem_limit),
    )(kmax, qf, kf, vf, proj_t)
    return out.reshape(B, H, N, Dv)


# TODO(synk): causal path (CausalDotProduct), output_attentions branch, and the
# generalized_attention / no_projection variants are not implemented (module
# defaults use none of them).
# TODO(synk): lane-dense output packing (G = 128//Dv heads per output block) when
# Dv < 128 to avoid masked vst partial stores (most relevant on v5e).


# -----------------------------------------------------------------------------
# Pure-JAX reference (mirrors the PyTorch math) for a correctness check
# -----------------------------------------------------------------------------
def _softmax_kernel_ref(data, projection_matrix, is_query, eps=1e-4):
    d = data.shape[-1]
    normalizer = d ** (-0.25)
    ratio = projection_matrix.shape[0] ** (-0.5)
    data_dash = jnp.einsum("bhid,jd->bhij", normalizer * data, projection_matrix)
    diag_data = jnp.sum(data ** 2, axis=-1)[..., None] / 2.0 * normalizer ** 2
    if is_query:
        return ratio * (jnp.exp(data_dash - diag_data
                                - jnp.max(data_dash, axis=-1, keepdims=True)) + eps)
    return ratio * (jnp.exp(data_dash - diag_data - jnp.max(data_dash)) + eps)


def _linear_attention_ref(q, k, v):
    k_cumsum = jnp.sum(k, axis=-2)
    d_inv = 1.0 / jnp.einsum("bhnd,bhd->bhn", q, k_cumsum)
    context = jnp.einsum("bhnd,bhne->bhde", k, v)
    return jnp.einsum("bhde,bhnd,bhn->bhne", context, q, d_inv)


def fast_attention_ref(q, k, v, projection_matrix):
    qp = _softmax_kernel_ref(q, projection_matrix, is_query=True)
    kp = _softmax_kernel_ref(k, projection_matrix, is_query=False)
    return _linear_attention_ref(qp, kp, v)


# -----------------------------------------------------------------------------
if __name__ == "__main__":
    B, H, N = 2, 2, 8
    dim_heads = 16
    nb_features = int(dim_heads * math.log(dim_heads))  # module default -> 44

    key = jax.random.PRNGKey(0)
    kq, kk, kv, kp = jax.random.split(key, 4)
    q = jax.random.normal(kq, (B, H, N, dim_heads), dtype=jnp.float32)
    k = jax.random.normal(kk, (B, H, N, dim_heads), dtype=jnp.float32)
    v = jax.random.normal(kv, (B, H, N, dim_heads), dtype=jnp.float32)

    projection_matrix = gaussian_orthogonal_random_matrix(
        nb_features, dim_heads, kp, scaling=0).astype(jnp.float32)

    out = jax.block_until_ready(fast_attention(q, k, v, projection_matrix))

    ref = jax.block_until_ready(fast_attention_ref(q, k, v, projection_matrix))
    np.testing.assert_allclose(np.asarray(out), np.asarray(ref),
                               rtol=5e-2, atol=5e-2)

    print("KERNEL_OK")
</pallas_src>

<mosaic_0001>
module attributes {stable_mosaic.version = 11 : i64} {
  func.func @_kmax_kernel(%arg0: i32, %arg1: i32, %arg2: memref<1x8x16xf32, #tpu.memory_space<vmem>>, %arg3: memref<16x128xf32, #tpu.memory_space<vmem>>, %arg4: memref<1x8x128xf32, #tpu.memory_space<vmem>>) attributes {dimension_semantics = [#tpu.dimension_semantics<parallel>, #tpu.dimension_semantics<arbitrary>], iteration_bounds = array<i64: 4, 1>, scalar_prefetch = 0 : i64, scratch_operands = 0 : i64, tpu.core_type = #tpu.core_type<tc>, window_params = [{transform_indices = @transform_0, window_bounds = array<i64: 1, 8, 16>}, {pipeline_mode = #tpu.pipeline_mode<synchronous>, transform_indices = @transform_1, window_bounds = array<i64: 16, 128>}, {transform_indices = @transform_2, window_bounds = array<i64: 1, 8, 128>}]} {
    %c0 = arith.constant 0 : index
    %c0_0 = arith.constant 0 : index
    %c0_1 = arith.constant 0 : index
    %0 = vector.load %arg2[%c0, %c0_0, %c0_1] : memref<1x8x16xf32, #tpu.memory_space<vmem>>, vector<1x8x16xf32>
    %1 = vector.shape_cast %0 : vector<1x8x16xf32> to vector<8x16xf32>
    %c0_2 = arith.constant 0 : index
    %c0_3 = arith.constant 0 : index
    %2 = vector.load %arg3[%c0_2, %c0_3] : memref<16x128xf32, #tpu.memory_space<vmem>>, vector<16x128xf32>
    %cst = arith.constant dense<0.000000e+00> : vector<8x128xf32>
    %3 = tpu.matmul %1, %2, %cst {dimension_numbers = #tpu.dot_dimension_numbers<[1], [0], [0], [1], [0, 0, 1, 1], [], []>} : vector<8x16xf32>, vector<16x128xf32>, vector<8x128xf32> -> vector<8x128xf32>
    %4 = tpu.iota {dimensions = array<i32: 1>} : vector<8x128xi32>
    %c44_i32 = arith.constant 44 : i32
    %5 = vector.broadcast %c44_i32 : i32 to vector<8x128xi32>
    %6 = arith.cmpi slt, %4, %5 : vector<8x128xi32>
    %cst_4 = arith.constant 0xFF800000 : f32
    %7 = vector.broadcast %cst_4 : f32 to vector<8x128xf32>
    %8 = arith.select %6, %3, %7 : vector<8x128xi1>, vector<8x128xf32>
    %c0_i32 = arith.constant 0 : i32
    %9 = arith.cmpi eq, %arg1, %c0_i32 : i32
    %10 = arith.extui %9 : i1 to i32
    %c0_i32_5 = arith.constant 0 : i32
    %11 = arith.cmpi ne, %10, %c0_i32_5 : i32
    scf.if %11 {
      %cst_13 = arith.constant 0xFF800000 : f32
      %20 = vector.broadcast %cst_13 : f32 to vector<1x8x128xf32>
      %c0_14 = arith.constant 0 : index
      %c0_15 = arith.constant 0 : index
      %c0_16 = arith.constant 0 : index
      %21 = vector.load %arg4[%c0_14, %c0_15, %c0_16] : memref<1x8x128xf32, #tpu.memory_space<vmem>>, vector<1x8x128xf32>
      tpu.vector_store %arg4[%c0_14, %c0_15, %c0_16], %20 {strides = array<i32>} : memref<1x8x128xf32, #tpu.memory_space<vmem>>, vector<1x8x128xf32>,
    } else {
    }
    %c0_6 = arith.constant 0 : index
    %c0_7 = arith.constant 0 : index
    %c0_8 = arith.constant 0 : index
    %12 = vector.load %arg4[%c0_6, %c0_7, %c0_8] : memref<1x8x128xf32, #tpu.memory_space<vmem>>, vector<1x8x128xf32>
    %13 = vector.shape_cast %8 : vector<8x128xf32> to vector<1x8x128xf32>
    %cst_9 = arith.constant dense<0xFF800000> : vector<1xf32>
    %14 = vector.multi_reduction <maximumf>, %13, %cst_9 [1, 2] : vector<1x8x128xf32> to vector<1xf32>
    %15 = vector.shape_cast %14 : vector<1xf32> to vector<1x1x1xf32>
    %16 = vector.extract %15[0, 0, 0] : f32 from vector<1x1x1xf32>
    %17 = vector.broadcast %16 : f32 to vector<1x8x128xf32>
    %18 = arith.maximumf %12, %17 : vector<1x8x128xf32>
    %c0_10 = arith.constant 0 : index
    %c0_11 = arith.constant 0 : index
    %c0_12 = arith.constant 0 : index
    %19 = vector.load %arg4[%c0_10, %c0_11, %c0_12] : memref<1x8x128xf32, #tpu.memory_space<vmem>>, vector<1x8x128xf32>
    tpu.vector_store %arg4[%c0_10, %c0_11, %c0_12], %18 {strides = array<i32>} : memref<1x8x128xf32, #tpu.memory_space<vmem>>, vector<1x8x128xf32>,
    return
  }
  func.func @transform_0(%arg0: i32, %arg1: i32) -> (i32, i32, i32) {
    %c0_i32 = arith.constant 0 : i32
    %c0_i32_0 = arith.constant 0 : i32
    return %arg0, %arg1, %c0_i32 : i32, i32, i32
  }
  func.func @transform_1(%arg0: i32, %arg1: i32) -> (i32, i32) {
    %c0_i32 = arith.constant 0 : i32
    %c0_i32_0 = arith.constant 0 : i32
    %c0_i32_1 = arith.constant 0 : i32
    return %c0_i32, %c0_i32_0 : i32, i32
  }
  func.func @transform_2(%arg0: i32, %arg1: i32) -> (i32, i32, i32) {
    %c0_i32 = arith.constant 0 : i32
    %c0_i32_0 = arith.constant 0 : i32
    %c0_i32_1 = arith.constant 0 : i32
    return %arg0, %c0_i32, %c0_i32_0 : i32, i32, i32
  }
}

</mosaic_0001>

<bundles_post_ra>
// kernel: tpu_custom_call.1
= control target key start
LH: loop header
LB: loop body
LE: loop exit
PB: predicated region body
PF: predicated region fallthrough
CT: control target
= control target key end

     0   :  { %7 = vsyncpa [#allocation3], 0  ;;  %s828_s0 = inlined_call_operand.hbm [shape: f32[4,8,16], index: 0, kind: input, shape index: {}]   ;;  %s829_s1 = inlined_call_operand.hbm [shape: f32[16,128], index: 1, kind: input, shape index: {}]   ;;  %s830_s2 = inlined_call_operand.hbm [shape: f32[4,8,128], index: 2, kind: output, shape index: {}]  }
   0x1   :  { %9 = vsyncpa [#allocation3 + $0x1], 0 }
   0x2   :  { %10 = vsyncpa [#allocation6], 0 }
   0x3   :  { %11 = vsyncpa [#allocation4], 0 }
   0x4   :  { %13 = vsyncpa [#allocation4 + $0x1], 0  ;;  %s659_s9 = smov 0   ;;  %s661_s10 = smov 0  }
   0x5   :  { %s663_s11 = smov 0   ;;  %s665_s12 = smov 0  }
   0x6   :  { %s667_s13 = smov 0   ;;  %s669_s14 = smov 0  }
   0x7 LB: > { %s391_s15 = sadd.s32 4294967295, %s635_s14   ;;  %s392_s16 = sadd.s32 4294967294, %s635_s14   ;;  %s635_s14 = sphi %s669_s14, %s19_s14   ;;  %s631_s13 = sphi %s667_s13, %s847_s13   ;;  %s627_s12 = sphi %s665_s12, %s846_s12   ;;  %s623_s11 = sphi %s663_s11, %s845_s11   ;;  %s619_s10 = sphi %s661_s10, %s844_s10   ;;  %s615_s9 = sphi %s659_s9, %s843_s9  }
   0x8   : > { %p53_p0 = scmp.ne.s32.totalorder %s619_s10, %s615_s9  ;;  %p693_p1 = scmp.eq.s32.totalorder %s391_s15, 0 }
   0x9   : > { %p697_p2 = scmp.eq.s32.totalorder %s391_s15, 3  ;;  %p104_p3 = scmp.eq.s32.totalorder %s392_s16, 3 }
   0xa   : > { %p703_p4 = por %p693_p1, %p53_p0  ;;  %p393_p5 = scmp.ge.s32.totalorder %s635_s14, 1 }
   0xb   : > { %p708_p6 = por %p104_p3, %p53_p0  ;;  %p111_p7 = scmp.lt.s32.totalorder %s635_s14, 5 }
   0xc   : > { %s637_s22 = smov [#allocation5]   ;;  %s31_s25 = sadd.s32 1, %s631_s13 }
   0xd   : > { %s835_s20 = scalar_select %p708_p6, 1, 0 }
   0xe   : > { %p713_p8 = pnand %p393_p5, %p111_p7  ;;  %s123_s23 = sshll.u32 %s637_s22, 4  ;;  %s124_s23 = int_to_ptr.vmem [resolvable:$true] %s123_s23 }
   0xf   : > { %s508_s26 = scalar_lea.vmem %s124_s23, 256  ;;  %p516_p3 = scmp.lt.s32.totalorder %s124_s23, %s124_s23 }
  0x10   : > { %p427_p9 = pneg %p713_p8  ;;  %p509_p12 = scmp.ne.s32.totalorder %s124_s23, %s508_s26 }
  0x11   : > { %p517_p5 = scmp.lt.s32.totalorder %s508_s26, %s508_s26 }
  0x12   : > { %p721_p10 = pnand %p427_p9, %p693_p1 }
  0x13   : > { %p518_p7 = por %p517_p5, %p516_p3 }
  0x14   : > { %p499_p11 = pneg %p721_p10 }
  0x16   : > { %p511_p13 = pnand %p509_p12, %p499_p11 }
  0x18   : > { %p512_p0 = pneg %p511_p13 }
  0x1a   : > { %p519_p6 = pnand %p518_p7, %p512_p0 }
  0x1c   : > { %522 = shalt.err (!%p519_p6)
}
  0x1d   : > { %s638_s27 = smov 128   ;;  %s639_s28 = smov 8  }
  0x1e   : > { %430 = dma.hbm_to_vmem [thread:$0]  (!%p721_p10), %s829_s1, 256, %s124_s23, [#allocation6], %s638_s27, %s638_s27, %s639_s28  }
  0x1f   : > { %p33_p9 = scmp.ge.s32.totalorder %s31_s25, 4  ;;  %s40_s3 = sadd.s32 1, %s623_s11 }
  0x20   : > { %p47_p6 = scmp.ne.s32.totalorder %s623_s11, %s619_s10  ;;  %p48_p11 = scmp.eq.s32.totalorder %s635_s14, 0 }
  0x21   : > { %s849_s25 = smov (%p33_p9, %s31_s25), 0  ;;  %p440_p0 = scmp.lt.s32.totalorder %s635_s14, 4 }
  0x22   : > { %p739_p12 = por %p48_p11, %p47_p6  ;;  %p745_p13 = por %p697_p2, %p47_p6 }
  0x23   : > { %s35_s6 = ssub.s32 %s631_s13, %s849_s25  ;;  %s137_s7 = sand.u32 1, %s623_s11  }
  0x24   : > { %s839_s5 = scalar_select %p745_p13, 1, 0 }
  0x25   : > { %p38_p10 = scmp.eq.s32.totalorder %s35_s6, 0  ;;  %s396_s8 = sshll.u32 %s137_s7, 3 }
  0x26   : > { %s397_s16 = sshll.u32 %s631_s13, 7  ;;  %s141_s26 = scalar_lea.vmem [#allocation2], %s396_s8 }
  0x27   : > { %s754_s15 = scalar_select %p38_p10, %s623_s11, %s40_s3  }
  0x28   : > { %s147_s24 = scalar_lea.hbm %s828_s0, %s397_s16  ;;  %s149_s27 = sshll.u32 %s141_s26, 4  ;;  %s150_s27 = int_to_ptr.vmem [resolvable:$true] %s149_s27 }
  0x29   : > { %p762_p2 = pnand %p440_p0, %p739_p12  ;;  %s138_s28 = scalar_lea.sflag [#allocation3], %s137_s7 }
  0x2a   : > { %s536_s29 = scalar_lea.vmem %s150_s27, 128  ;;  %s640_s30 = smov [#allocation2]  }
  0x2b   : > { %p525_p3 = pneg %p762_p2  ;;  %p537_p5 = scmp.ne.s32.totalorder %s150_s27, %s536_s29 }
  0x2c   : > { %s541_s3 = sshll.u32 %s640_s30, 4  ;;  %s542_s3 = int_to_ptr.vmem [resolvable:$false] %s541_s3 }
  0x2d   : > { %p539_p7 = pnand %p537_p5, %p525_p3  ;;  %s543_s6 = scalar_lea.vmem %s542_s3, 256 }
  0x2e   : > { %p544_p6 = scmp.lt.s32.totalorder %s150_s27, %s542_s3  ;;  %p545_p11 = scmp.lt.s32.totalorder %s543_s6, %s536_s29 }
  0x2f   : > { %p540_p9 = pneg %p539_p7 }
  0x30   : > { %p546_p10 = por %p545_p11, %p544_p6 }
  0x32   : > { %p547_p13 = pnand %p546_p10, %p540_p9 }
  0x34   : > { %550 = shalt.err (!%p547_p13)
}
  0x35   : > { %434 = dma.hbm_to_vmem [thread:$0]  (!%p762_p2), %s147_s24, 128, %s150_s27, %s138_s28  }
  0x36   : > { %158 = sbr.rel (%p713_p8) target bundleno = 475 (0x1db), region = 28  ;;  %s773_s4 = sand.u32 (!%p713_p8), 1, %s619_s10  }
  0x37   : > { %s399_s7 = sshll.u32 (!%p713_p8), %s773_s4, 3  ;;  %s161_s8 = scalar_lea.sflag (!%p713_p8), [#allocation3], %s773_s4 }
  0x38   : > { %s164_s16 = scalar_lea.vmem (!%p713_p8), [#allocation2], %s399_s7 }
  0x3b   : > { %602 = dma.done.wait (%p703_p4), %s161_s8, 128  }
  0x3c   : > { %604 = vsyncadd (%p703_p4), %s161_s8, 4294967168 }
  0x3d   : > { %606 = dma.done.wait (%p693_p1), [#allocation6], 256  }
  0x3e   : > { %608 = vsyncadd (%p693_p1), [#allocation6], 4294967040  ;;  %v641_v0 = vmov 0.0   ;;  %vm642_vm0 = vmmov 0   ;;  %v191_v1 = vld [vmem:[#allocation5 + $0x8] sm:$0xff]  ;;  %v190_v2 = vld [vmem:[#allocation5] sm:$0xff]  ;;  %v266_v4 = vlaneseq }
  0x3f   : > { %410 = vmatprep.subr.mxu0 %v641_v0  ;;  %414 = vmatprep.mubr.msk.f32.mxu0 %vm642_vm0, %v641_v0  ;;  %v189_v3 = vld [vmem:[%s164_s16] sm:$0xff]  ;;  %vm192_vm1 = vcmask 130048   ;;  %s404_s17 = sshll.u32 %s627_s12, 7  ;;  %s188_s19 = scalar_lea.vmem [#allocation7], %s399_s7 }
  0x40   : > { %411 = vmatpush3.msra.mxu0 %v191_v1  ;;  %v267_v5 = vand.u32 127, %v266_v4  ;;  %s302_s21 = sshll.u32 %s188_s19, 4  ;;  %s300_s26 = scalar_lea.hbm %s830_s2, %s404_s17  ;;  %s303_s21 = int_to_ptr.vmem [resolvable:$true] %s302_s21 }
  0x41   : > { %412 = vmatprep.subr.mxu0 %v641_v0  ;;  %s289_s27 = scalar_lea.sflag [#allocation4], %s773_s4  ;;  %s551_s18 = scalar_lea.vmem %s303_s21, 128 }
  0x42   : > { %413 = vmatpush3.msra.mxu0 %v190_v2  ;;  %vm268_vm2 = vcmp.lt.s32.totalorder %v267_v5, 44  ;;  %p552_p1 = scmp.ne.s32.totalorder %s303_s21, %s551_s18  ;;  %p841_p4 = scmp.ne.s32.totalorder %s839_s5, 0 }
  0x43   : > { %415 = vmatmul.mubr.msk.f32.vlgmr.msra.gmra.mxu0 %vm192_vm1, %v189_v3  ;;  %s643_s28 = smov [#allocation7]  }
  0x44   : > { %p553_p8 = pnand %p552_p1, %p841_p4  ;;  %s555_s29 = sshll.u32 %s643_s28, 4  ;;  %s556_s29 = int_to_ptr.vmem [resolvable:$false] %s555_s29 }
  0x45   : > { %s557_s12 = scalar_lea.vmem %s556_s29, 256  ;;  %p558_p13 = scmp.lt.s32.totalorder %s303_s21, %s556_s29 }
  0x46   : > { %p554_p12 = pneg %p553_p8  ;;  %p559_p0 = scmp.lt.s32.totalorder %s557_s12, %s551_s18 }
  0x48   : > { %p560_p2 = por %p559_p0, %p558_p13 }
  0x4a   : > { %p561_p3 = pnand %p560_p2, %p554_p12 }
 0x103   : > { %v262_v6 = vpop.f32.mrf.mxu0 }
 0x104   : > { %v269_v7 = vsel %vm268_vm2, %v262_v6, -inf }
 0x105   : > { %v416_v8 = vpop.f32.mrf.mxu0  ;;  %276 = vmax.xlane.f32.xlu0 %v269_v7 }
 0x18e   : > { %v277_v9 = vpop.xlane.xlu0 %276 }
 0x18f   : > { %v278_v10 = vrot.slane %v277_v9, 4 }
 0x191   : > { %v279_v11 = vmax.f32 %v277_v9, %v278_v10 }
 0x193   : > { %v280_v12 = vrot.slane %v279_v11, 2 }
 0x195   : > { %v281_v13 = vmax.f32 %v279_v11, %v280_v12 }
 0x197   : > { %v282_v14 = vrot.slane %v281_v13, 1 }
 0x199   : > { %v283_v15 = vmax.f32 %v281_v13, %v282_v14 }
 0x19b   : > { %417 = vpush %v283_v15 }
 0x1cc   : > { %s418_s22 = spop %417 }
 0x1cd   : > { %v285_v16 = vstv %s418_s22 }
 0x1ce   : > { %287 = vst [vmem:[%s188_s19] sm:$0xff] %v285_v16 }
 0x1cf   : > { %564 = shalt.err (!%p561_p3)
}
 0x1d0   : > { %s565_s30 = scalar_lea.hbm %s300_s26, 128  ;;  %s569_s4 = scalar_lea.hbm %s830_s2, 512 }
 0x1d1   : > { %p566_p5 = scmp.ne.s32.totalorder %s300_s26, %s565_s30  ;;  %p570_p6 = scmp.lt.s32.totalorder %s300_s26, %s830_s2 }
 0x1d2   : > { %p571_p11 = scmp.lt.s32.totalorder %s569_s4, %s565_s30 }
 0x1d3   : > { %p567_p7 = pnand %p566_p5, %p841_p4 }
 0x1d4   : > { %p572_p10 = por %p571_p11, %p570_p6 }
 0x1d5   : > { %p568_p9 = pneg %p567_p7 }
 0x1d7   : > { %p573_p1 = pnand %p572_p10, %p568_p9 }
 0x1d9   : > { %576 = shalt.err (!%p573_p1)
}
 0x1da   : > { %425 = dma.vmem_to_hbm [thread:$0]  (%p841_p4), %s303_s21, 128, %s300_s26, %s289_s27  }
 0x1db PF: > { %p442_p8 = scmp.ge.s32.totalorder %s635_s14, 2  ;;  %s314_s16 = sand.u32 1, %s615_s9  }
 0x1dc   : > { %p842_p12 = scmp.ne.s32.totalorder %s835_s20, 0  ;;  %s315_s17 = scalar_lea.sflag [#allocation4], %s314_s16 }
 0x1de   : > { %p436_p13 = pnand %p442_p8, %p842_p12 }
 0x1e0   : > { %p437_p0 = pneg %p436_p13 }
 0x1e2   : > { %610 = dma.done.wait (%p437_p0), %s315_s17, 128  }
 0x1e3   : > { %612 = vsyncadd (%p437_p0), %s315_s17, 4294967168  ;;  %s19_s14 = sadd.s32 1, %s635_s14   ;;  %s843_s9 = smov %s619_s10 }
 0x1e4   : > { %p16_p2 = scmp.ge.s32.totalorder %s19_s14, 6   ;;  %s844_s10 = smov %s623_s11 }
 0x1e5   : > { %s845_s11 = smov %s754_s15  ;;  %s846_s12 = smov %s631_s13 }
 0x1e6   : > { %s847_s13 = smov %s849_s25  ;;  %18 = sbr.rel (!%p16_p2) target bundleno = 7 (0x7), region = 81 }
 0x1eb   :  { %320 = vsyncpa [#allocation3], 1 }
 0x1ec   :  { %322 = vsyncpa [#allocation3 + $0x1], 1 }
 0x1ed   :  { %323 = vsyncpa [#allocation6], 1 }
 0x1ee   :  { %324 = vsyncpa [#allocation4], 1 }
 0x1ef   :  { %326 = vsyncpa [#allocation4 + $0x1], 1 }

</bundles_post_ra>
